<compile_context>
chip_gen: v6e
topology: v6e:2x2x1
jax: 0.10.0
libtpu: 0.0.40
codegen_flags: <defaults>
</compile_context>

<pallas_src>
import jax
import jax.numpy as jnp
from jax.experimental import pallas as pl
from jax.experimental.pallas import tpu as pltpu

D_BERT = 768      # BERT hidden size (fixed by the module)
EMBED = 640       # embeddingSize (module default)
DROPOUT_P = 0.5   # nn.Dropout() default
MAX_TILE_M = 512  # rows per grid step; multiple of 256 for v6e/v7x MXU passes


def _round_up(n, m):
    return ((n + m - 1) // m) * m


def _head_kernel(x_ref, w_ref, b_ref, o_ref):
    """y = x @ W + b on one batch tile.  x, W are bf16; accumulate in f32."""
    x = x_ref[...]                                             # [TM, 768] bf16
    w = w_ref[...]                                             # [768, 640] bf16
    y = jnp.dot(x, w, preferred_element_type=jnp.float32)     # MXU, f32 acc
    o_ref[...] = (y + b_ref[...]).astype(o_ref.dtype)          # [TM, 640]


def fold_head_params(params):
    """Fold linear1∘linear2 into one affine map (exact; no nonlinearity between
    them and dropout acts before linear1).  Call ONCE at parameter-load time —
    not per forward.  If this head is ever trained, keep the unfolded params
    and re-fold after each optimizer step."""
    w1 = params["w1"].astype(jnp.float32)            # [768, 640]
    b1 = params["b1"].astype(jnp.float32)            # [1, 640]
    w2 = params["w2"].astype(jnp.float32)            # [640, 640]
    b2 = params["b2"].astype(jnp.float32)            # [1, 640]
    w_folded = jnp.dot(w1, w2).astype(jnp.bfloat16)  # [768, 640] bf16
    b_folded = (jnp.dot(b1, w2) + b2).astype(jnp.float32)      # [1, 640] f32
    return w_folded, b_folded


def _pick_tile_m(batch):
    """>=2 grid steps for non-trivial batches (both v7x TCs), 16-row (bf16
    packed-sublane) alignment, capped at MAX_TILE_M (multiple of 256)."""
    half = -(-batch // 2)                            # cdiv(B, 2)
    return min(MAX_TILE_M, _round_up(max(half, 1), 16))


def text_encoder_head(x, w_folded, b_folded, *, out_dtype=jnp.float32):
    """x: [B, 768] float -> [B, 640] out_dtype, via the fused Pallas matmul."""
    B = x.shape[0]
    tile_m = _pick_tile_m(B)
    grid_m = pl.cdiv(B, tile_m)      # partial last block; OOB rows never reduced

    xp = x.astype(jnp.bfloat16)      # halve activation DMA bytes

    out_itemsize = jnp.dtype(out_dtype).itemsize
    cost = pl.CostEstimate(
        flops=2 * grid_m * tile_m * D_BERT * EMBED,
        transcendentals=0,
        bytes_accessed=(grid_m * tile_m * D_BERT * 2          # activations bf16
                        + D_BERT * EMBED * 2 + EMBED * 4      # folded W + bias
                        + grid_m * tile_m * EMBED * out_itemsize),
    )

    # NOTE: weight/bias blocks are grid-invariant; pipeline_mode=pl.Buffered(1)
    # would single-buffer them (~1 MiB VMEM saved) — skipped as VMEM use is
    # already <10 MiB at TM=512.
    out = pl.pallas_call(
        _head_kernel,
        out_shape=jax.ShapeDtypeStruct((B, EMBED), out_dtype),
        grid=(grid_m,),
        in_specs=[
            pl.BlockSpec((tile_m, D_BERT), lambda i: (i, 0)),   # activations
            pl.BlockSpec((D_BERT, EMBED), lambda i: (0, 0)),    # folded W (bf16)
            pl.BlockSpec((1, EMBED), lambda i: (0, 0)),         # folded bias
        ],
        out_specs=pl.BlockSpec((tile_m, EMBED), lambda i: (i, 0)),
        compiler_params=pltpu.CompilerParams(
            dimension_semantics=("parallel",),       # shard batch tiles across TCs
        ),
        cost_estimate=cost,
    )(xp, w_folded, b_folded)
    return out


def cls_embedding(ids, embed_table, mask=None):
    """Deterministic stand-in for bert(ids, mask)[0][:, 0, :].

    Only the [CLS] (position 0) row is consumed by the module, so gather just
    that row — never materialise the full [B, S, 768] sequence.
    """
    cls = embed_table[ids[:, 0]]                     # [B, 768]
    if mask is not None:
        cls = cls * mask[:, 0:1].astype(cls.dtype)
    return cls


def modified_text_encoder_forward(ids, mask, embed_table, w_folded, b_folded,
                                  *, training=False, rng=None,
                                  out_dtype=jnp.float32):
    cls_vec = cls_embedding(ids, embed_table, mask)              # [B, 768]

    if training and DROPOUT_P > 0.0:
        # Inverted dropout (nn.Dropout train mode); caller must supply a fresh
        # rng every step — no silent fixed-key fallback.
        if rng is None:
            raise ValueError("training=True requires an explicit `rng`")
        keep = jax.random.bernoulli(rng, 1.0 - DROPOUT_P, cls_vec.shape)
        cls_vec = jnp.where(keep, cls_vec * (1.0 / (1.0 - DROPOUT_P)), 0.0)

    return text_encoder_head(cls_vec, w_folded, b_folded, out_dtype=out_dtype)


def init_params(key, vocab=32):
    k0, k1, k2, k3, k4 = jax.random.split(key, 5)
    # PyTorch nn.Linear default init: U(-1/sqrt(fan_in), 1/sqrt(fan_in)).
    lim1 = 1.0 / jnp.sqrt(jnp.float32(D_BERT))
    lim2 = 1.0 / jnp.sqrt(jnp.float32(EMBED))
    return {
        "embed_table": jax.random.normal(k0, (vocab, D_BERT), jnp.float32) * 0.02,
        # stored [in, out] so the head computes x @ W + b (== PyTorch x @ W.T)
        "w1": jax.random.uniform(k1, (D_BERT, EMBED), jnp.float32, -lim1, lim1),
        "b1": jax.random.uniform(k2, (1, EMBED), jnp.float32, -lim1, lim1),
        "w2": jax.random.uniform(k3, (EMBED, EMBED), jnp.float32, -lim2, lim2),
        "b2": jax.random.uniform(k4, (1, EMBED), jnp.float32, -lim2, lim2),
    }


if __name__ == "__main__":
    key = jax.random.PRNGKey(0)
    pkey, ikey = jax.random.split(key)

    B, S, VOCAB = 4, 8, 32
    params = init_params(pkey, vocab=VOCAB)
    ids = jax.random.randint(ikey, (B, S), 0, VOCAB, dtype=jnp.int32)
    mask = jnp.ones((B, S), dtype=jnp.int32)

    # Fold the two linear layers ONCE at parameter-load time (hoisted out of
    # the forward path per perf feedback).
    w_folded, b_folded = fold_head_params(params)
    w_folded = jax.block_until_ready(w_folded)

    # Eval-mode forward (dropout = identity) through the Pallas kernel.
    out = modified_text_encoder_forward(ids, mask, params["embed_table"],
                                        w_folded, b_folded, training=False)
    out = jax.block_until_ready(out)
    assert out.shape == (B, EMBED), out.shape

    # References.
    cls_ref = cls_embedding(ids, params["embed_table"], mask)    # [B, 768]

    # (a) folded bf16 reference — same numerics as the kernel.
    ref_fold = jnp.dot(cls_ref.astype(jnp.bfloat16), w_folded,
                       preferred_element_type=jnp.float32) + b_folded
    assert jnp.allclose(out, ref_fold, atol=1e-3, rtol=1e-2), (
        float(jnp.max(jnp.abs(out - ref_fold))))

    # (b) original two-linear f32 reference (module semantics); looser tolerance
    # accounts for bf16 weight quantization + the (exact) algebraic folding.
    ref_full = (cls_ref @ params["w1"] + params["b1"]) @ params["w2"] + params["b2"]
    assert jnp.allclose(out, ref_full, atol=5e-3, rtol=5e-2), (
        float(jnp.max(jnp.abs(out - ref_full))))

    # Train-mode forward (wrapper-side stochastic dropout) — check it runs.
    out_train = modified_text_encoder_forward(
        ids, mask, params["embed_table"], w_folded, b_folded,
        training=True, rng=jax.random.PRNGKey(123))
    out_train = jax.block_until_ready(out_train)
    assert out_train.shape == (B, EMBED), out_train.shape

    # Optional bf16-output path (downstream-tolerant; cuts output HBM stream).
    out_bf16 = modified_text_encoder_forward(
        ids, mask, params["embed_table"], w_folded, b_folded,
        training=False, out_dtype=jnp.bfloat16)
    out_bf16 = jax.block_until_ready(out_bf16)
    assert out_bf16.shape == (B, EMBED) and out_bf16.dtype == jnp.bfloat16

    print("KERNEL_OK")
</pallas_src>

<mosaic_0001>
module attributes {stable_mosaic.version = 11 : i64} {
  func.func @_head_kernel(%arg0: i32, %arg1: memref<16x768xbf16, #tpu.memory_space<vmem>>, %arg2: memref<768x640xbf16, #tpu.memory_space<vmem>>, %arg3: memref<1x640xf32, #tpu.memory_space<vmem>>, %arg4: memref<16x640xf32, #tpu.memory_space<vmem>>) attributes {dimension_semantics = [#tpu.dimension_semantics<parallel>], iteration_bounds = array<i64: 1>, scalar_prefetch = 0 : i64, scratch_operands = 0 : i64, tpu.core_type = #tpu.core_type<tc>, window_params = [{transform_indices = @transform_0, window_bounds = array<i64: 16, 768>}, {pipeline_mode = #tpu.pipeline_mode<synchronous>, transform_indices = @transform_1, window_bounds = array<i64: 768, 640>}, {pipeline_mode = #tpu.pipeline_mode<synchronous>, transform_indices = @transform_2, window_bounds = array<i64: 1, 640>}, {transform_indices = @transform_3, window_bounds = array<i64: 16, 640>}]} {
    %c0 = arith.constant 0 : index
    %c0_0 = arith.constant 0 : index
    %0 = vector.load %arg1[%c0, %c0_0] : memref<16x768xbf16, #tpu.memory_space<vmem>>, vector<16x768xbf16>
    %c0_1 = arith.constant 0 : index
    %c0_2 = arith.constant 0 : index
    %1 = vector.load %arg2[%c0_1, %c0_2] : memref<768x640xbf16, #tpu.memory_space<vmem>>, vector<768x640xbf16>
    %cst = arith.constant dense<0.000000e+00> : vector<16x640xf32>
    %2 = tpu.matmul %0, %1, %cst {dimension_numbers = #tpu.dot_dimension_numbers<[1], [0], [0], [1], [0, 0, 1, 1], [], []>} : vector<16x768xbf16>, vector<768x640xbf16>, vector<16x640xf32> -> vector<16x640xf32>
    %c0_3 = arith.constant 0 : index
    %c0_4 = arith.constant 0 : index
    %3 = vector.load %arg3[%c0_3, %c0_4] : memref<1x640xf32, #tpu.memory_space<vmem>>, vector<1x640xf32>
    %4 = vector.broadcast %3 : vector<1x640xf32> to vector<16x640xf32>
    %5 = arith.addf %2, %4 : vector<16x640xf32>
    %c0_5 = arith.constant 0 : index
    %c0_6 = arith.constant 0 : index
    %6 = vector.load %arg4[%c0_5, %c0_6] : memref<16x640xf32, #tpu.memory_space<vmem>>, vector<16x640xf32>
    tpu.vector_store %arg4[%c0_5, %c0_6], %5 {strides = array<i32>} : memref<16x640xf32, #tpu.memory_space<vmem>>, vector<16x640xf32>,
    return
  }
  func.func @transform_0(%arg0: i32) -> (i32, i32) {
    %c0_i32 = arith.constant 0 : i32
    %c0_i32_0 = arith.constant 0 : i32
    return %arg0, %c0_i32 : i32, i32
  }
  func.func @transform_1(%arg0: i32) -> (i32, i32) {
    %c0_i32 = arith.constant 0 : i32
    %c0_i32_0 = arith.constant 0 : i32
    %c0_i32_1 = arith.constant 0 : i32
    return %c0_i32, %c0_i32_0 : i32, i32
  }
  func.func @transform_2(%arg0: i32) -> (i32, i32) {
    %c0_i32 = arith.constant 0 : i32
    %c0_i32_0 = arith.constant 0 : i32
    %c0_i32_1 = arith.constant 0 : i32
    return %c0_i32, %c0_i32_0 : i32, i32
  }
  func.func @transform_3(%arg0: i32) -> (i32, i32) {
    %c0_i32 = arith.constant 0 : i32
    %c0_i32_0 = arith.constant 0 : i32
    return %arg0, %c0_i32 : i32, i32
  }
}

</mosaic_0001>

<bundles_post_ra>
// kernel: tpu_custom_call.1
= control target key start
LH: loop header
LB: loop body
LE: loop exit
PB: predicated region body
PF: predicated region fallthrough
CT: control target
= control target key end

     0   :  { %8 = vsyncpa [#allocation3], 0  ;;  %s2988_s0 = inlined_call_operand.hbm [shape: bf16[4,768], index: 0, kind: input, shape index: {}]   ;;  %s2989_s1 = inlined_call_operand.hbm [shape: bf16[768,640], index: 1, kind: input, shape index: {}]   ;;  %s2990_s2 = inlined_call_operand.hbm [shape: f32[1,640], index: 2, kind: input, shape index: {}]   ;;  %s2991_s3 = inlined_call_operand.hbm [shape: f32[4,640], index: 3, kind: output, shape index: {}]  }
   0x1   :  { %9 = vsyncpa [#allocation6], 0 }
   0x2   :  { %10 = vsyncpa [#allocation4], 0 }
   0x3   :  { %15 = vsyncadd [#allocation3], 576  ;;  %s2880_s12 = smov [#allocation5]  }
   0x4   :  { %s28_s13 = sshll.u32 %s2880_s12, 4  ;;  %s29_s13 = int_to_ptr.vmem [resolvable:$true] %s28_s13 }
   0x5   :  { %s2802_s14 = scalar_lea.vmem %s29_s13, 30720  ;;  %p2807_p1 = scmp.lt.s32.totalorder %s29_s13, %s29_s13 }
   0x6   :  { %p2803_p0 = scmp.ne.s32.totalorder %s29_s13, %s2802_s14  ;;  %p2808_p2 = scmp.lt.s32.totalorder %s2802_s14, %s2802_s14 }
   0x8   :  { %p2809_p3 = por %p2808_p2, %p2807_p1 }
   0xa   :  { %p2810_p4 = pnand %p2809_p3, %p2803_p0 }
   0xc   :  { %2813 = shalt.err (!%p2810_p4)
}
   0xd   :  { %s2881_s15 = smov 320   ;;  %s2882_s16 = smov 20  }
   0xe   :  { %34 = dma.hbm_to_vmem [thread:$0]  %s2989_s1, 30720, %s29_s13, [#allocation6], %s2881_s15, %s2881_s15, %s2882_s16  }
   0xf   :  { %s2883_s19 = smov [#allocation2]  }
  0x10   :  { %s16_s20 = sshll.u32 %s2883_s19, 4  ;;  %s17_s20 = int_to_ptr.vmem [resolvable:$true] %s16_s20 }
  0x11   :  { %s2822_s21 = scalar_lea.vmem %s17_s20, 192  ;;  %s2826_s22 = scalar_lea.vmem %s17_s20, 768 }
  0x12   :  { %p2823_p5 = scmp.ne.s32.totalorder %s17_s20, %s2822_s21  ;;  %p2827_p6 = scmp.lt.s32.totalorder %s17_s20, %s17_s20 }
  0x13   :  { %p2828_p7 = scmp.lt.s32.totalorder %s2826_s22, %s2822_s21 }
  0x15   :  { %p2829_p8 = por %p2828_p7, %p2827_p6 }
  0x17   :  { %p2830_p9 = pnand %p2829_p8, %p2823_p5 }
  0x19   :  { %2833 = shalt.err (!%p2830_p9)
}
  0x1a   :  { %s2884_s23 = smov 192   ;;  %s2885_s24 = smov 12  }
  0x1b   :  { %22 = dma.hbm_to_vmem [thread:$0]  %s2988_s0, 192, %s17_s20, [#allocation3], %s2884_s23, %s2884_s23, %s2885_s24  }
  0x1c   :  { %s2886_s27 = smov [#allocation7]  }
  0x1d   :  { %s41_s28 = sshll.u32 %s2886_s27, 4  ;;  %s42_s28 = int_to_ptr.vmem [resolvable:$true] %s41_s28 }
  0x1e   :  { %s2842_s1 = scalar_lea.vmem %s42_s28, 80  ;;  %s2846_s29 = scalar_lea.vmem %s42_s28, 96 }
  0x1f   :  { %p2843_p10 = scmp.ne.s32.totalorder %s42_s28, %s2842_s1  ;;  %p2847_p11 = scmp.lt.s32.totalorder %s42_s28, %s42_s28 }
  0x20   :  { %p2848_p12 = scmp.lt.s32.totalorder %s2846_s29, %s2842_s1 }
  0x22   :  { %p2849_p13 = por %p2848_p12, %p2847_p11 }
  0x24   :  { %p2850_p0 = pnand %p2849_p13, %p2843_p10 }
  0x26   :  { %2853 = shalt.err (!%p2850_p0)
}
  0x27   :  { %44 = dma.hbm_to_vmem [thread:$0]  %s2990_s2, 80, %s42_s28, [#allocation6]  }
  0x28   :  { %2874 = dma.done.wait [#allocation3], 768  }
  0x29   :  { %2875 = vsyncadd [#allocation3], 4294966528 }
  0x2a   :  { %2876 = dma.done.wait [#allocation6], 30800  }
  0x2b   :  { %2877 = vsyncadd [#allocation6], 4294936496  ;;  %v2450_v0 = vld [vmem:[#allocation5 + $0x11c] ss:$20 sps:$4 sm:$0xff]   ;;  %v2452_v1 = vld [vmem:[#allocation5 + $0x118] ss:$20 sps:$4 sm:$0xff]   ;;  %v353_v37 = vlaneseq }
  0x2c   :  { %1694 = vmatprep.subr.bf16.mxu0 %v2450_v0  ;;  %v2453_v2 = vld [vmem:[#allocation5 + $0x39c] ss:$20 sps:$4 sm:$0xff]   ;;  %v2455_v3 = vld [vmem:[#allocation5 + $0x398] ss:$20 sps:$4 sm:$0xff]   ;;  %v2456_v4 = vld [vmem:[#allocation5 + $0xf4] ss:$20 sps:$4 sm:$0xff]  }
  0x2d   :  { %1695 = vmatpush1.bf16.msra.mxu0 %v2452_v1  ;;  %v2458_v5 = vld [vmem:[#allocation5 + $0xf0] ss:$20 sps:$4 sm:$0xff]   ;;  %1737 = vmatprep.subr.bf16.mxu1 %v2453_v2  ;;  %v2459_v6 = vld [vmem:[#allocation5 + $0x374] ss:$20 sps:$4 sm:$0xff]   ;;  %v2462_v8 = vld [vmem:[#allocation5 + $0xcc] ss:$20 sps:$4 sm:$0xff]  }
  0x2e   :  { %1738 = vmatpush1.bf16.msra.mxu1 %v2455_v3  ;;  %1696 = vmatprep.subr.bf16.mxu0 %v2456_v4  ;;  %v2461_v7 = vld [vmem:[#allocation5 + $0x370] ss:$20 sps:$4 sm:$0xff]   ;;  %v2464_v9 = vld [vmem:[#allocation5 + $0xc8] ss:$20 sps:$4 sm:$0xff]   ;;  %v2465_v10 = vld [vmem:[#allocation5 + $0x34c] ss:$20 sps:$4 sm:$0xff]  }
  0x2f   :  { %1739 = vmatprep.subr.bf16.mxu1 %v2459_v6  ;;  %v2468_v11 = vld [vmem:[#allocation5 + $0xa4] ss:$20 sps:$4 sm:$0xff]   ;;  %v2467_v12 = vld [vmem:[#allocation5 + $0x348] ss:$20 sps:$4 sm:$0xff]   ;;  %v2470_v14 = vld [vmem:[#allocation5 + $0xa0] ss:$20 sps:$4 sm:$0xff]  }
  0x30   :  { %v2471_v13 = vld [vmem:[#allocation5 + $0x324] ss:$20 sps:$4 sm:$0xff]   ;;  %v2474_v15 = vld [vmem:[#allocation5 + $0x7c] ss:$20 sps:$4 sm:$0xff]   ;;  %v2473_v16 = vld [vmem:[#allocation5 + $0x320] ss:$20 sps:$4 sm:$0xff]  }
  0x31   :  { %1697 = vmatpush1.bf16.msra.mxu0 %v2458_v5  ;;  %v2477_v17 = vld [vmem:[#allocation5 + $0x2fc] ss:$20 sps:$4 sm:$0xff]   ;;  %v2476_v18 = vld [vmem:[#allocation5 + $0x78] ss:$20 sps:$4 sm:$0xff]   ;;  %v2480_v19 = vld [vmem:[#allocation5 + $0x54] ss:$20 sps:$4 sm:$0xff]  }
  0x32   :  { %1698 = vmatprep.subr.bf16.mxu0 %v2462_v8  ;;  %1740 = vmatpush1.bf16.msra.mxu1 %v2461_v7  ;;  %v2479_v20 = vld [vmem:[#allocation5 + $0x2f8] ss:$20 sps:$4 sm:$0xff]   ;;  %v2483_v21 = vld [vmem:[#allocation5 + $0x2d4] ss:$20 sps:$4 sm:$0xff]   ;;  %v2482_v22 = vld [vmem:[#allocation5 + $0x50] ss:$20 sps:$4 sm:$0xff]  }
  0x33   :  { %1741 = vmatprep.subr.bf16.mxu1 %v2465_v10  ;;  %v2486_v23 = vld [vmem:[#allocation5 + $0x2c] ss:$20 sps:$4 sm:$0xff]   ;;  %v2485_v24 = vld [vmem:[#allocation5 + $0x2d0] ss:$20 sps:$4 sm:$0xff]   ;;  %v2488_v26 = vld [vmem:[#allocation5 + $0x28] ss:$20 sps:$4 sm:$0xff]  }
  0x34   :  { %v2489_v25 = vld [vmem:[#allocation5 + $0x2ac] ss:$20 sps:$4 sm:$0xff]   ;;  %v2492_v27 = vld [vmem:[#allocation5 + $0x4] ss:$20 sps:$4 sm:$0xff]   ;;  %v2491_v28 = vld [vmem:[#allocation5 + $0x2a8] ss:$20 sps:$4 sm:$0xff]  }
  0x35   :  { %1699 = vmatpush1.bf16.msra.mxu0 %v2464_v9  ;;  %v2495_v29 = vld [vmem:[#allocation5 + $0x284] ss:$20 sps:$4 sm:$0xff]   ;;  %v2494_v30 = vld [vmem:[#allocation5] ss:$20 sps:$4 sm:$0xff]   ;;  %v2498_v31 = vld [vmem:[#allocation5 + $0x25c] ss:$20 sps:$4 sm:$0xff]  }
  0x36   :  { %1700 = vmatprep.subr.bf16.mxu0 %v2468_v11  ;;  %1742 = vmatpush1.bf16.msra.mxu1 %v2467_v12  ;;  %v2497_v32 = vld [vmem:[#allocation5 + $0x280] ss:$20 sps:$4 sm:$0xff]   ;;  %v2501_v33 = vld [vmem:[#allocation5 + $0x4dc] ss:$20 sps:$4 sm:$0xff]   ;;  %v2500_v34 = vld [vmem:[#allocation5 + $0x258] ss:$20 sps:$4 sm:$0xff]  }
  0x37   :  { %1743 = vmatprep.subr.bf16.mxu1 %v2471_v13  ;;  %v2504_v35 = vld [vmem:[#allocation5 + $0x234] ss:$20 sps:$4 sm:$0xff]   ;;  %v2503_v36 = vld [vmem:[#allocation5 + $0x4d8] ss:$20 sps:$4 sm:$0xff]   ;;  %v2887_v38 = vmov 1983009808  }
  0x38   :  { %v391_v39 = vunpack.c.l.s4 %v2887_v38  ;;  %v2507_v40 = vld [vmem:[#allocation5 + $0x4b4] ss:$20 sps:$4 sm:$0xff]   ;;  %v2506_v41 = vld [vmem:[#allocation5 + $0x230] ss:$20 sps:$4 sm:$0xff]   ;;  %v2510_v42 = vld [vmem:[#allocation5 + $0x20c] ss:$20 sps:$4 sm:$0xff]  }
  0x39   :  { %1701 = vmatpush1.bf16.msra.mxu0 %v2470_v14  ;;  %v2509_v43 = vld [vmem:[#allocation5 + $0x4b0] ss:$20 sps:$4 sm:$0xff]   ;;  %v2921_v44 = vshrl.u32 %v353_v37, 7  ;;  %v2513_v46 = vld [vmem:[#allocation5 + $0x48c] ss:$20 sps:$4 sm:$0xff]  }
  0x3a   :  { %1702 = vmatprep.subr.bf16.mxu0 %v2474_v15  ;;  %1744 = vmatpush1.bf16.msra.mxu1 %v2473_v16  ;;  %v392_v45 = vunpack.c.0.s8 %v391_v39  ;;  %v2512_v47 = vld [vmem:[#allocation5 + $0x208] ss:$20 sps:$4 sm:$0xff]   ;;  %v2516_v49 = vld [vmem:[#allocation5 + $0x1e4] ss:$20 sps:$4 sm:$0xff]   ;;  %v2518_v50 = vld [vmem:[#allocation5 + $0x1e0] ss:$20 sps:$4 sm:$0xff]  }
  0x3b   :  { %1745 = vmatprep.subr.bf16.mxu1 %v2477_v17  ;;  %v2515_v48 = vld [vmem:[#allocation5 + $0x488] ss:$20 sps:$4 sm:$0xff]   ;;  %v2519_v52 = vld [vmem:[#allocation5 + $0x464] ss:$20 sps:$4 sm:$0xff]   ;;  %v2521_v56 = vld [vmem:[#allocation5 + $0x460] ss:$20 sps:$4 sm:$0xff]  }
  0x3c   :  { %v2924_v51 = vsub.s32 %v392_v45, %v2921_v44  ;;  %v2545_v53 = vld [vmem:[#allocation2] ss:$12 sps:$4 sm:$0xff]   ;;  %v2547_v55 = vld [vmem:[#allocation2 + $0x18] ss:$12 sps:$4 sm:$0xff]   ;;  %v2554_v61 = vld [vmem:[#allocation2 + $0x1c] ss:$12 sps:$4 sm:$0xff]  }
  0x3d   :  { %1703 = vmatpush1.bf16.msra.mxu0 %v2476_v18  ;;  %v2522_v54 = vld [vmem:[#allocation5 + $0x1bc] ss:$20 sps:$4 sm:$0xff]   ;;  %v2553_v60 = vld [vmem:[#allocation2 + $0x4] ss:$12 sps:$4 sm:$0xff]   ;;  %v2524_v62 = vld [vmem:[#allocation5 + $0x1b8] ss:$20 sps:$4 sm:$0xff]  }
  0x3e   :  { %1704 = vmatprep.subr.bf16.mxu0 %v2480_v19  ;;  %1746 = vmatpush1.bf16.msra.mxu1 %v2479_v20  ;;  %v2525_v57 = vld [vmem:[#allocation5 + $0x43c] ss:$20 sps:$4 sm:$0xff]   ;;  %v396_v58 = vrot.slane %v2545_v53, %v2924_v51  ;;  %v410_v59 = vrot.slane %v2547_v55, %v2924_v51  ;;  %v2528_v63 = vld [vmem:[#allocation5 + $0x194] ss:$20 sps:$4 sm:$0xff]   ;;  %v403_v1 = vrot.slane %v2553_v60, %v2924_v51  ;;  %v2527_v3 = vld [vmem:[#allocation5 + $0x438] ss:$20 sps:$4 sm:$0xff]  }
  0x3f   :  { %1747 = vmatprep.subr.bf16.mxu1 %v2483_v21  ;;  %v417_v2 = vrot.slane %v2554_v61, %v2924_v51  ;;  %v2531_v4 = vld [vmem:[#allocation5 + $0x414] ss:$20 sps:$4 sm:$0xff]   ;;  %v2530_v6 = vld [vmem:[#allocation5 + $0x190] ss:$20 sps:$4 sm:$0xff]   ;;  %v2534_v7 = vld [vmem:[#allocation5 + $0x16c] ss:$20 sps:$4 sm:$0xff]  }
  0x40   :  { %v2928_v0 = vcombine.high %v396_v58, %v410_v59  ;;  %v2533_v8 = vld [vmem:[#allocation5 + $0x410] ss:$20 sps:$4 sm:$0xff]   ;;  %v2537_v9 = vld [vmem:[#allocation5 + $0x3ec] ss:$20 sps:$4 sm:$0xff]   ;;  %v2536_v10 = vld [vmem:[#allocation5 + $0x168] ss:$20 sps:$4 sm:$0xff]   ;;  %v2936_v17 = vcombine.low %v396_v58, %v410_v59 }
  0x41   :  { %1705 = vmatpush1.bf16.msra.mxu0 %v2482_v22  ;;  %v2933_v5 = vcombine.high %v403_v1, %v417_v2  ;;  %v2540_v11 = vld [vmem:[#allocation5 + $0x144] ss:$20 sps:$4 sm:$0xff]   ;;  %v2539_v12 = vld [vmem:[#allocation5 + $0x3e8] ss:$20 sps:$4 sm:$0xff]   ;;  %v2542_v14 = vld [vmem:[#allocation5 + $0x140] ss:$20 sps:$4 sm:$0xff]   ;;  %v2938_v20 = vcombine.low %v403_v1, %v417_v2 }
  0x42   :  { %1706 = vmatprep.subr.bf16.mxu0 %v2486_v23  ;;  %1748 = vmatpush1.bf16.msra.mxu1 %v2485_v24  ;;  %v2543_v13 = vld [vmem:[#allocation5 + $0x3c4] ss:$20 sps:$4 sm:$0xff]   ;;  %v2552_v15 = vld [vmem:[#allocation5 + $0x61c] ss:$20 sps:$4 sm:$0xff]   ;;  %v2549_v16 = vld [vmem:[#allocation5 + $0x3c0] ss:$20 sps:$4 sm:$0xff]  }
  0x43   :  { %1749 = vmatprep.subr.bf16.mxu1 %v2489_v25  ;;  %1726 = vmatprep.mubr.bf16.mxu0 %v2928_v0  ;;  %v2557_v18 = vld [vmem:[#allocation5 + $0x124] ss:$20 sps:$4 sm:$0xff]   ;;  %v2560_v21 = vld [vmem:[#allocation5 + $0x5f4] ss:$20 sps:$4 sm:$0xff]   ;;  %v2563_v23 = vld [vmem:[#allocation5 + $0xfc] ss:$20 sps:$4 sm:$0xff]  }
  0x44   :  { %1769 = vmatprep.mubr.bf16.mxu1 %v2933_v5  ;;  %v2550_v19 = vld [vmem:[#allocation5 + $0x618] ss:$20 sps:$4 sm:$0xff]   ;;  %v2555_v22 = vld [vmem:[#allocation5 + $0x120] ss:$20 sps:$4 sm:$0xff]   ;;  %v2558_v24 = vld [vmem:[#allocation5 + $0x5f0] ss:$20 sps:$4 sm:$0xff]  }
  0x45   :  { %1707 = vmatpush1.bf16.msra.mxu0 %v2488_v26  ;;  %v2566_v25 = vld [vmem:[#allocation5 + $0x5cc] ss:$20 sps:$4 sm:$0xff]   ;;  %v2584_v37 = vld [vmem:[#allocation5 + $0x554] ss:$20 sps:$4 sm:$0xff]   ;;  %v2587_v39 = vld [vmem:[#allocation5 + $0x5c] ss:$20 sps:$4 sm:$0xff]  }
  0x46   :  { %1708 = vmatprep.subr.bf16.mxu0 %v2492_v27  ;;  %1750 = vmatpush1.bf16.msra.mxu1 %v2491_v28  ;;  %v2561_v26 = vld [vmem:[#allocation5 + $0xf8] ss:$20 sps:$4 sm:$0xff]   ;;  %v2569_v27 = vld [vmem:[#allocation5 + $0xd4] ss:$20 sps:$4 sm:$0xff]   ;;  %v2602_v55 = vld [vmem:[#allocation5 + $0x75c] ss:$20 sps:$4 sm:$0xff]  }
  0x47   :  { %1751 = vmatprep.subr.bf16.mxu1 %v2495_v29  ;;  %v2564_v28 = vld [vmem:[#allocation5 + $0x5c8] ss:$20 sps:$4 sm:$0xff]   ;;  %v2572_v29 = vld [vmem:[#allocation5 + $0x5a4] ss:$20 sps:$4 sm:$0xff]   ;;  %v2579_v38 = vld [vmem:[#allocation5 + $0x80] ss:$20 sps:$4 sm:$0xff]  }
  0x48   :  { %v2593_v45 = vld [vmem:[#allocation5 + $0x34] ss:$20 sps:$4 sm:$0xff]   ;;  %v2605_v58 = vld [vmem:[#allocation5 + $0x264] ss:$20 sps:$4 sm:$0xff]  }
  0x49   :  { %1709 = vmatpush1.bf16.msra.mxu0 %v2494_v30  ;;  %v2567_v30 = vld [vmem:[#allocation5 + $0xd0] ss:$20 sps:$4 sm:$0xff]   ;;  %v2600_v59 = vld [vmem:[#allocation5 + $0x758] ss:$20 sps:$4 sm:$0xff]   ;;  %v2608_v60 = vld [vmem:[#allocation5 + $0x734] ss:$20 sps:$4 sm:$0xff]  }
  0x4a   :  { %1710 = vmatprep.subr.bf16.mxu0 %v2498_v31  ;;  %1752 = vmatpush1.bf16.msra.mxu1 %v2497_v32  ;;  %v2575_v31 = vld [vmem:[#allocation5 + $0xac] ss:$20 sps:$4 sm:$0xff]   ;;  %v2617_v2 = vld [vmem:[#allocation5 + $0x214] ss:$20 sps:$4 sm:$0xff]  }
  0x4b   :  { %1753 = vmatprep.subr.bf16.mxu1 %v2501_v33  ;;  %v2570_v32 = vld [vmem:[#allocation5 + $0x5a0] ss:$20 sps:$4 sm:$0xff]   ;;  %v2578_v33 = vld [vmem:[#allocation5 + $0x57c] ss:$20 sps:$4 sm:$0xff]   ;;  %v2609_v1 = vld [vmem:[#allocation5 + $0x238] ss:$20 sps:$4 sm:$0xff]  }
  0x4c   :  { %v2603_v61 = vld [vmem:[#allocation5 + $0x260] ss:$20 sps:$4 sm:$0xff]  }
  0x4d   :  { %1711 = vmatpush2.bf16.msra.mxu0 %v2500_v34  ;;  %v2573_v34 = vld [vmem:[#allocation5 + $0xa8] ss:$20 sps:$4 sm:$0xff]  }
  0x4e   :  { %1712 = vmatprep.subr.bf16.mxu0 %v2504_v35  ;;  %1754 = vmatpush2.bf16.msra.mxu1 %v2503_v36  ;;  %v2581_v35 = vld [vmem:[#allocation5 + $0x84] ss:$20 sps:$4 sm:$0xff]  }
  0x4f   :  { %1755 = vmatprep.subr.bf16.mxu1 %v2507_v40  ;;  %v2576_v36 = vld [vmem:[#allocation5 + $0x578] ss:$20 sps:$4 sm:$0xff]   ;;  %v2582_v40 = vld [vmem:[#allocation5 + $0x550] ss:$20 sps:$4 sm:$0xff]  }
  0x51   :  { %1713 = vmatpush2.bf16.msra.mxu0 %v2506_v41  ;;  %v2590_v41 = vld [vmem:[#allocation5 + $0x52c] ss:$20 sps:$4 sm:$0xff]  }
  0x52   :  { %1714 = vmatprep.subr.bf16.mxu0 %v2510_v42  ;;  %1756 = vmatpush2.bf16.msra.mxu1 %v2509_v43  ;;  %v2585_v42 = vld [vmem:[#allocation5 + $0x58] ss:$20 sps:$4 sm:$0xff]   ;;  %v2588_v43 = vld [vmem:[#allocation5 + $0x528] ss:$20 sps:$4 sm:$0xff]  }
  0x53   :  { %1757 = vmatprep.subr.bf16.mxu1 %v2513_v46  ;;  %v2591_v46 = vld [vmem:[#allocation5 + $0x30] ss:$20 sps:$4 sm:$0xff]  }
  0x55   :  { %1715 = vmatpush2.bf16.msra.mxu0 %v2512_v47  ;;  %v2596_v47 = vld [vmem:[#allocation5 + $0x504] ss:$20 sps:$4 sm:$0xff]  }
  0x56   :  { %1716 = vmatprep.subr.bf16.mxu0 %v2516_v49  ;;  %1758 = vmatpush2.bf16.msra.mxu1 %v2515_v48  ;;  %v2648_v48 = vld [vmem:[#allocation2 + $0x8] ss:$12 sps:$4 sm:$0xff]   ;;  %v2649_v49 = vld [vmem:[#allocation2 + $0x20] ss:$12 sps:$4 sm:$0xff]  }
  0x57   :  { %1759 = vmatprep.subr.bf16.mxu1 %v2519_v52  ;;  %v2594_v52 = vld [vmem:[#allocation5 + $0x500] ss:$20 sps:$4 sm:$0xff]   ;;  %v2944_v53 = vrot.slane %v2648_v48, %v2924_v51 }
  0x58   :  { %v2674_v48 = vld [vmem:[#allocation5 + $0x300] ss:$20 sps:$4 sm:$0xff]  }
  0x59   :  { %1717 = vmatpush2.bf16.msra.mxu0 %v2518_v50  ;;  %v2599_v50 = vld [vmem:[#allocation5 + $0xc] ss:$20 sps:$4 sm:$0xff]  }
  0x5a   :  { %1718 = vmatprep.subr.bf16.mxu0 %v2522_v54  ;;  %1760 = vmatpush2.bf16.msra.mxu1 %v2521_v56  ;;  %v2947_v54 = vrot.slane %v2649_v49, %v2924_v51  ;;  %v2597_v56 = vld [vmem:[#allocation5 + $0x8] ss:$20 sps:$4 sm:$0xff]  }
  0x5b   :  { %1761 = vmatprep.subr.bf16.mxu1 %v2525_v57  ;;  %v2611_v51 = vld [vmem:[#allocation5 + $0x23c] ss:$20 sps:$4 sm:$0xff]  }
  0x5c   :  { %v2951_v57 = vcombine.high %v2944_v53, %v2947_v54  ;;  %v2682_v49 = vld [vmem:[#allocation5 + $0x2dc] ss:$20 sps:$4 sm:$0xff]  }
  0x5d   :  { %1719 = vmatpush2.bf16.msra.mxu0 %v2524_v62  ;;  %v2606_v62 = vld [vmem:[#allocation5 + $0x730] ss:$20 sps:$4 sm:$0xff]  }
  0x5e   :  { %1720 = vmatprep.subr.bf16.mxu0 %v2528_v63  ;;  %1762 = vmatpush2.bf16.msra.mxu1 %v2527_v3  ;;  %v2614_v63 = vld [vmem:[#allocation5 + $0x70c] ss:$20 sps:$4 sm:$0xff]   ;;  %v2612_v3 = vld [vmem:[#allocation5 + $0x708] ss:$20 sps:$4 sm:$0xff]  }
  0x5f   :  { %1763 = vmatprep.subr.bf16.mxu1 %v2531_v4  ;;  %v2620_v4 = vld [vmem:[#allocation5 + $0x6e4] ss:$20 sps:$4 sm:$0xff]  }
  0x61   :  { %1721 = vmatpush2.bf16.msra.mxu0 %v2530_v6  ;;  %v2615_v6 = vld [vmem:[#allocation5 + $0x210] ss:$20 sps:$4 sm:$0xff]  }
  0x62   :  { %1722 = vmatprep.subr.bf16.mxu0 %v2534_v7  ;;  %1764 = vmatpush2.bf16.msra.mxu1 %v2533_v8  ;;  %v2623_v7 = vld [vmem:[#allocation5 + $0x1ec] ss:$20 sps:$4 sm:$0xff]  }
  0x63   :  { %1765 = vmatprep.subr.bf16.mxu1 %v2537_v9  ;;  %v2618_v8 = vld [vmem:[#allocation5 + $0x6e0] ss:$20 sps:$4 sm:$0xff]   ;;  %v2626_v9 = vld [vmem:[#allocation5 + $0x6bc] ss:$20 sps:$4 sm:$0xff]  }
  0x65   :  { %1723 = vmatpush2.bf16.msra.mxu0 %v2536_v10  ;;  %v2621_v10 = vld [vmem:[#allocation5 + $0x1e8] ss:$20 sps:$4 sm:$0xff]  }
  0x66   :  { %1724 = vmatprep.subr.bf16.mxu0 %v2540_v11  ;;  %1766 = vmatpush2.bf16.msra.mxu1 %v2539_v12  ;;  %v2629_v11 = vld [vmem:[#allocation5 + $0x1c4] ss:$20 sps:$4 sm:$0xff]  }
  0x67   :  { %1767 = vmatprep.subr.bf16.mxu1 %v2543_v13  ;;  %v2624_v12 = vld [vmem:[#allocation5 + $0x6b8] ss:$20 sps:$4 sm:$0xff]   ;;  %v2632_v13 = vld [vmem:[#allocation5 + $0x694] ss:$20 sps:$4 sm:$0xff]  }
  0x69   :  { %1725 = vmatpush2.bf16.msra.mxu0 %v2542_v14  ;;  %v2627_v14 = vld [vmem:[#allocation5 + $0x1c0] ss:$20 sps:$4 sm:$0xff]  }
  0x6a   :  { %1780 = vmatprep.subr.bf16.mxu0 %v2552_v15  ;;  %1768 = vmatpush2.bf16.msra.mxu1 %v2549_v16  ;;  %v2635_v15 = vld [vmem:[#allocation5 + $0x19c] ss:$20 sps:$4 sm:$0xff]  }
  0x6b   :  { %1823 = vmatprep.subr.bf16.mxu1 %v2557_v18  ;;  %v2630_v16 = vld [vmem:[#allocation5 + $0x690] ss:$20 sps:$4 sm:$0xff]   ;;  %v2638_v18 = vld [vmem:[#allocation5 + $0x66c] ss:$20 sps:$4 sm:$0xff]  }
  0x6c   :  { %1727 = vmatmul.mubr.bf16.vlgmr.msra.gmra.mxu0 %v2936_v17 }
  0x6d   :  { %1781 = vmatpush1.bf16.msra.mxu0 %v2550_v19  ;;  %1770 = vmatmul.mubr.bf16.vlgmr.msra.gmra.mxu1 %v2938_v20  ;;  %v2633_v19 = vld [vmem:[#allocation5 + $0x198] ss:$20 sps:$4 sm:$0xff]  }
  0x6e   :  { %1782 = vmatprep.subr.bf16.mxu0 %v2560_v21  ;;  %1824 = vmatpush1.bf16.msra.mxu1 %v2555_v22  ;;  %v2641_v21 = vld [vmem:[#allocation5 + $0x174] ss:$20 sps:$4 sm:$0xff]  }
  0x6f   :  { %1855 = vmatprep.mubr.bf16.mxu1 %v2928_v0  ;;  %1825 = vmatprep.subr.bf16.mxu1 %v2563_v23  ;;  %v2636_v22 = vld [vmem:[#allocation5 + $0x668] ss:$20 sps:$4 sm:$0xff]   ;;  %v2644_v23 = vld [vmem:[#allocation5 + $0x644] ss:$20 sps:$4 sm:$0xff]  }
  0x70   :  { %1812 = vmatprep.mubr.bf16.mxu0 %v2951_v57 }
  0x71   :  { %1783 = vmatpush1.bf16.msra.mxu0 %v2558_v24  ;;  %v2639_v24 = vld [vmem:[#allocation5 + $0x170] ss:$20 sps:$4 sm:$0xff]  }
  0x72   :  { %1784 = vmatprep.subr.bf16.mxu0 %v2566_v25  ;;  %1826 = vmatpush1.bf16.msra.mxu1 %v2561_v26  ;;  %v2647_v25 = vld [vmem:[#allocation5 + $0x14c] ss:$20 sps:$4 sm:$0xff]  }
  0x73   :  { %1827 = vmatprep.subr.bf16.mxu1 %v2569_v27  ;;  %v2642_v26 = vld [vmem:[#allocation5 + $0x640] ss:$20 sps:$4 sm:$0xff]   ;;  %v2652_v27 = vld [vmem:[#allocation5 + $0x3a4] ss:$20 sps:$4 sm:$0xff]  }
  0x75   :  { %1785 = vmatpush1.bf16.msra.mxu0 %v2564_v28  ;;  %v2645_v28 = vld [vmem:[#allocation5 + $0x148] ss:$20 sps:$4 sm:$0xff]  }
  0x76   :  { %1786 = vmatprep.subr.bf16.mxu0 %v2572_v29  ;;  %1828 = vmatpush1.bf16.msra.mxu1 %v2567_v30  ;;  %v2956_v29 = vcombine.low %v2944_v53, %v2947_v54  ;;  %v2655_v30 = vld [vmem:[#allocation5 + $0x624] ss:$20 sps:$4 sm:$0xff]   ;;  %v2688_v54 = vld [vmem:[#allocation5 + $0x2b4] ss:$20 sps:$4 sm:$0xff]  }
  0x77   :  { %1829 = vmatprep.subr.bf16.mxu1 %v2575_v31  ;;  %v2650_v31 = vld [vmem:[#allocation5 + $0x3a0] ss:$20 sps:$4 sm:$0xff]   ;;  %v2680_v53 = vld [vmem:[#allocation5 + $0x2d8] ss:$20 sps:$4 sm:$0xff]  }
  0x79   :  { %1787 = vmatpush1.bf16.msra.mxu0 %v2570_v32  ;;  %v2658_v32 = vld [vmem:[#allocation5 + $0x37c] ss:$20 sps:$4 sm:$0xff]  }
  0x7a   :  { %1788 = vmatprep.subr.bf16.mxu0 %v2578_v33  ;;  %1830 = vmatpush1.bf16.msra.mxu1 %v2573_v34  ;;  %v2653_v33 = vld [vmem:[#allocation5 + $0x620] ss:$20 sps:$4 sm:$0xff]   ;;  %v2661_v34 = vld [vmem:[#allocation5 + $0x5fc] ss:$20 sps:$4 sm:$0xff]  }
  0x7b   :  { %1831 = vmatprep.subr.bf16.mxu1 %v2581_v35  ;;  %v2656_v35 = vld [vmem:[#allocation5 + $0x378] ss:$20 sps:$4 sm:$0xff]  }
  0x7d   :  { %1789 = vmatpush1.bf16.msra.mxu0 %v2576_v36  ;;  %v2664_v36 = vld [vmem:[#allocation5 + $0x354] ss:$20 sps:$4 sm:$0xff]  }
  0x7e   :  { %1790 = vmatprep.subr.bf16.mxu0 %v2584_v37  ;;  %1832 = vmatpush1.bf16.msra.mxu1 %v2579_v38  ;;  %v2659_v37 = vld [vmem:[#allocation5 + $0x5f8] ss:$20 sps:$4 sm:$0xff]   ;;  %v2667_v38 = vld [vmem:[#allocation5 + $0x5d4] ss:$20 sps:$4 sm:$0xff]  }
  0x7f   :  { %1833 = vmatprep.subr.bf16.mxu1 %v2587_v39  ;;  %v2662_v39 = vld [vmem:[#allocation5 + $0x350] ss:$20 sps:$4 sm:$0xff]  }
  0x81   :  { %1791 = vmatpush1.bf16.msra.mxu0 %v2582_v40  ;;  %v2670_v40 = vld [vmem:[#allocation5 + $0x32c] ss:$20 sps:$4 sm:$0xff]  }
  0x82   :  { %1792 = vmatprep.subr.bf16.mxu0 %v2590_v41  ;;  %1834 = vmatpush1.bf16.msra.mxu1 %v2585_v42  ;;  %v2665_v41 = vld [vmem:[#allocation5 + $0x5d0] ss:$20 sps:$4 sm:$0xff]   ;;  %v2673_v42 = vld [vmem:[#allocation5 + $0x5ac] ss:$20 sps:$4 sm:$0xff]  }
  0x83   :  { %1835 = vmatprep.subr.bf16.mxu1 %v2593_v45  ;;  %v2676_v45 = vld [vmem:[#allocation5 + $0x304] ss:$20 sps:$4 sm:$0xff]  }
  0x85   :  { %1793 = vmatpush1.bf16.msra.mxu0 %v2588_v43  ;;  %v2668_v43 = vld [vmem:[#allocation5 + $0x328] ss:$20 sps:$4 sm:$0xff]  }
  0x86   :  { %1794 = vmatprep.subr.bf16.mxu0 %v2596_v47  ;;  %1836 = vmatpush1.bf16.msra.mxu1 %v2591_v46  ;;  %v2671_v46 = vld [vmem:[#allocation5 + $0x5a8] ss:$20 sps:$4 sm:$0xff]   ;;  %v2679_v47 = vld [vmem:[#allocation5 + $0x584] ss:$20 sps:$4 sm:$0xff]  }
  0x87   :  { %1837 = vmatprep.subr.bf16.mxu1 %v2599_v50  ;;  %v2677_v50 = vld [vmem:[#allocation5 + $0x580] ss:$20 sps:$4 sm:$0xff]  }
  0x89   :  { %1795 = vmatpush1.bf16.msra.mxu0 %v2594_v52  ;;  %v2685_v52 = vld [vmem:[#allocation5 + $0x55c] ss:$20 sps:$4 sm:$0xff]  }
  0x8a   :  { %1796 = vmatprep.subr.bf16.mxu0 %v2602_v55  ;;  %1838 = vmatpush1.bf16.msra.mxu1 %v2597_v56  ;;  %v2683_v55 = vld [vmem:[#allocation5 + $0x558] ss:$20 sps:$4 sm:$0xff]   ;;  %v2691_v56 = vld [vmem:[#allocation5 + $0x534] ss:$20 sps:$4 sm:$0xff]  }
  0x8b   :  { %1839 = vmatprep.subr.bf16.mxu1 %v2605_v58  ;;  %v2686_v58 = vld [vmem:[#allocation5 + $0x2b0] ss:$20 sps:$4 sm:$0xff]  }
  0x8d   :  { %1797 = vmatpush2.bf16.msra.mxu0 %v2600_v59  ;;  %v2694_v59 = vld [vmem:[#allocation5 + $0x28c] ss:$20 sps:$4 sm:$0xff]  }
  0x8e   :  { %1798 = vmatprep.subr.bf16.mxu0 %v2608_v60  ;;  %1840 = vmatpush2.bf16.msra.mxu1 %v2603_v61  ;;  %v2689_v60 = vld [vmem:[#allocation5 + $0x530] ss:$20 sps:$4 sm:$0xff]   ;;  %v2697_v61 = vld [vmem:[#allocation5 + $0x50c] ss:$20 sps:$4 sm:$0xff]  }
  0x8f   :  { %1841 = vmatprep.subr.bf16.mxu1 %v2611_v51  ;;  %v2692_v51 = vld [vmem:[#allocation5 + $0x288] ss:$20 sps:$4 sm:$0xff]  }
  0x91   :  { %1799 = vmatpush2.bf16.msra.mxu0 %v2606_v62  ;;  %v2700_v62 = vld [vmem:[#allocation5 + $0x4e4] ss:$20 sps:$4 sm:$0xff]  }
  0x92   :  { %1800 = vmatprep.subr.bf16.mxu0 %v2614_v63  ;;  %1842 = vmatpush2.bf16.msra.mxu1 %v2609_v1  ;;  %v2695_v63 = vld [vmem:[#allocation5 + $0x508] ss:$20 sps:$4 sm:$0xff]   ;;  %v2703_v1 = vld [vmem:[#allocation5 + $0x764] ss:$20 sps:$4 sm:$0xff]  }
  0x93   :  { %1843 = vmatprep.subr.bf16.mxu1 %v2617_v2  ;;  %v2698_v2 = vld [vmem:[#allocation5 + $0x4e0] ss:$20 sps:$4 sm:$0xff]  }
  0x95   :  { %1801 = vmatpush2.bf16.msra.mxu0 %v2612_v3  ;;  %v2706_v3 = vld [vmem:[#allocation5 + $0x4bc] ss:$20 sps:$4 sm:$0xff]  }
  0x96   :  { %1802 = vmatprep.subr.bf16.mxu0 %v2620_v4  ;;  %1844 = vmatpush2.bf16.msra.mxu1 %v2615_v6  ;;  %v2701_v4 = vld [vmem:[#allocation5 + $0x760] ss:$20 sps:$4 sm:$0xff]   ;;  %v2709_v6 = vld [vmem:[#allocation5 + $0x73c] ss:$20 sps:$4 sm:$0xff]  }
  0x97   :  { %1845 = vmatprep.subr.bf16.mxu1 %v2623_v7  ;;  %v2704_v7 = vld [vmem:[#allocation5 + $0x4b8] ss:$20 sps:$4 sm:$0xff]  }
  0x99   :  { %1803 = vmatpush2.bf16.msra.mxu0 %v2618_v8  ;;  %v2712_v8 = vld [vmem:[#allocation5 + $0x494] ss:$20 sps:$4 sm:$0xff]  }
  0x9a   :  { %1804 = vmatprep.subr.bf16.mxu0 %v2626_v9  ;;  %1846 = vmatpush2.bf16.msra.mxu1 %v2621_v10  ;;  %v2707_v9 = vld [vmem:[#allocation5 + $0x738] ss:$20 sps:$4 sm:$0xff]   ;;  %v2715_v10 = vld [vmem:[#allocation5 + $0x714] ss:$20 sps:$4 sm:$0xff]  }
  0x9b   :  { %1847 = vmatprep.subr.bf16.mxu1 %v2629_v11  ;;  %v2710_v11 = vld [vmem:[#allocation5 + $0x490] ss:$20 sps:$4 sm:$0xff]  }
  0x9d   :  { %1805 = vmatpush2.bf16.msra.mxu0 %v2624_v12  ;;  %v2718_v12 = vld [vmem:[#allocation5 + $0x46c] ss:$20 sps:$4 sm:$0xff]  }
  0x9e   :  { %1806 = vmatprep.subr.bf16.mxu0 %v2632_v13  ;;  %1848 = vmatpush2.bf16.msra.mxu1 %v2627_v14  ;;  %v2713_v13 = vld [vmem:[#allocation5 + $0x710] ss:$20 sps:$4 sm:$0xff]   ;;  %v2721_v14 = vld [vmem:[#allocation5 + $0x6ec] ss:$20 sps:$4 sm:$0xff]  }
  0x9f   :  { %1849 = vmatprep.subr.bf16.mxu1 %v2635_v15  ;;  %v2716_v15 = vld [vmem:[#allocation5 + $0x468] ss:$20 sps:$4 sm:$0xff]  }
  0xa1   :  { %1807 = vmatpush2.bf16.msra.mxu0 %v2630_v16  ;;  %v2724_v16 = vld [vmem:[#allocation5 + $0x444] ss:$20 sps:$4 sm:$0xff]  }
  0xa2   :  { %1808 = vmatprep.subr.bf16.mxu0 %v2638_v18  ;;  %1850 = vmatpush2.bf16.msra.mxu1 %v2633_v19  ;;  %v2719_v18 = vld [vmem:[#allocation5 + $0x6e8] ss:$20 sps:$4 sm:$0xff]   ;;  %v2727_v19 = vld [vmem:[#allocation5 + $0x6c4] ss:$20 sps:$4 sm:$0xff]  }
  0xa3   :  { %1851 = vmatprep.subr.bf16.mxu1 %v2641_v21  ;;  %v2722_v21 = vld [vmem:[#allocation5 + $0x440] ss:$20 sps:$4 sm:$0xff]  }
  0xa5   :  { %1809 = vmatpush2.bf16.msra.mxu0 %v2636_v22  ;;  %v2730_v22 = vld [vmem:[#allocation5 + $0x41c] ss:$20 sps:$4 sm:$0xff]  }
  0xa6   :  { %1810 = vmatprep.subr.bf16.mxu0 %v2644_v23  ;;  %1852 = vmatpush2.bf16.msra.mxu1 %v2639_v24  ;;  %v2725_v23 = vld [vmem:[#allocation5 + $0x6c0] ss:$20 sps:$4 sm:$0xff]   ;;  %v2733_v24 = vld [vmem:[#allocation5 + $0x69c] ss:$20 sps:$4 sm:$0xff]  }
  0xa7   :  { %1853 = vmatprep.subr.bf16.mxu1 %v2647_v25  ;;  %v2728_v25 = vld [vmem:[#allocation5 + $0x418] ss:$20 sps:$4 sm:$0xff]  }
  0xa9   :  { %1811 = vmatpush2.bf16.msra.mxu0 %v2642_v26  ;;  %v2736_v26 = vld [vmem:[#allocation5 + $0x3f4] ss:$20 sps:$4 sm:$0xff]  }
  0xaa   :  { %1866 = vmatprep.subr.bf16.mxu0 %v2652_v27  ;;  %1854 = vmatpush2.bf16.msra.mxu1 %v2645_v28  ;;  %v2731_v27 = vld [vmem:[#allocation5 + $0x698] ss:$20 sps:$4 sm:$0xff]   ;;  %v2739_v28 = vld [vmem:[#allocation5 + $0x674] ss:$20 sps:$4 sm:$0xff]  }
  0xab   :  { %1909 = vmatprep.subr.bf16.mxu1 %v2655_v30  ;;  %v2734_v30 = vld [vmem:[#allocation5 + $0x3f0] ss:$20 sps:$4 sm:$0xff]  }
  0xac   :  { %1813 = vmatmul.mubr.bf16.vlgmr.msra.gmra.mxu0 %v2956_v29 }
  0xad   :  { %1867 = vmatpush1.bf16.msra.mxu0 %v2650_v31  ;;  %1898 = vmatprep.mubr.bf16.mxu0 %v2933_v5  ;;  %v2742_v31 = vld [vmem:[#allocation5 + $0x3cc] ss:$20 sps:$4 sm:$0xff]  }
  0xae   :  { %1856 = vmatmul.mubr.bf16.vlgmr.msra.gmra.mxu1 %v2936_v17  ;;  %1868 = vmatprep.subr.bf16.mxu0 %v2658_v32  ;;  %v2737_v32 = vld [vmem:[#allocation5 + $0x670] ss:$20 sps:$4 sm:$0xff]  }
  0xaf   :  { %1910 = vmatpush1.bf16.msra.mxu1 %v2653_v33  ;;  %1941 = vmatprep.mubr.bf16.mxu1 %v2951_v57  ;;  %v2745_v33 = vld [vmem:[#allocation5 + $0x64c] ss:$20 sps:$4 sm:$0xff]  }
  0xb0   :  { %1911 = vmatprep.subr.bf16.mxu1 %v2661_v34  ;;  %v2740_v34 = vld [vmem:[#allocation5 + $0x3c8] ss:$20 sps:$4 sm:$0xff]  }
  0xb1   :  { %1869 = vmatpush1.bf16.msra.mxu0 %v2656_v35  ;;  %v2746_v35 = vld [vmem:[#allocation5 + $0x268] ss:$20 sps:$4 sm:$0xff]  }
  0xb2   :  { %1870 = vmatprep.subr.bf16.mxu0 %v2664_v36  ;;  %v2743_v36 = vld [vmem:[#allocation5 + $0x648] ss:$20 sps:$4 sm:$0xff]  }
  0xb3   :  { %1912 = vmatpush1.bf16.msra.mxu1 %v2659_v37  ;;  %v2748_v37 = vld [vmem:[#allocation5 + $0x4e8] ss:$20 sps:$4 sm:$0xff]  }
  0xb4   :  { %1913 = vmatprep.subr.bf16.mxu1 %v2667_v38  ;;  %v2747_v38 = vld [vmem:[#allocation5 + $0x128] ss:$20 sps:$4 sm:$0xff]  }
  0xb5   :  { %1871 = vmatpush1.bf16.msra.mxu0 %v2662_v39  ;;  %v2750_v39 = vld [vmem:[#allocation5 + $0x240] ss:$20 sps:$4 sm:$0xff]  }
  0xb6   :  { %1872 = vmatprep.subr.bf16.mxu0 %v2670_v40  ;;  %v2749_v40 = vld [vmem:[#allocation5 + $0x3a8] ss:$20 sps:$4 sm:$0xff]  }
  0xb7   :  { %1914 = vmatpush1.bf16.msra.mxu1 %v2665_v41  ;;  %v2752_v41 = vld [vmem:[#allocation5 + $0x4c0] ss:$20 sps:$4 sm:$0xff]  }
  0xb8   :  { %1915 = vmatprep.subr.bf16.mxu1 %v2673_v42  ;;  %v2751_v42 = vld [vmem:[#allocation5 + $0x100] ss:$20 sps:$4 sm:$0xff]  }
  0xb9   :  { %1873 = vmatpush1.bf16.msra.mxu0 %v2668_v43  ;;  %v2754_v43 = vld [vmem:[#allocation5 + $0x218] ss:$20 sps:$4 sm:$0xff]  }
  0xba   :  { %1874 = vmatprep.subr.bf16.mxu0 %v2676_v45  ;;  %v2753_v45 = vld [vmem:[#allocation5 + $0x380] ss:$20 sps:$4 sm:$0xff]  }
  0xbb   :  { %1916 = vmatpush1.bf16.msra.mxu1 %v2671_v46  ;;  %v2756_v46 = vld [vmem:[#allocation5 + $0x498] ss:$20 sps:$4 sm:$0xff]  }
  0xbc   :  { %1917 = vmatprep.subr.bf16.mxu1 %v2679_v47  ;;  %v2755_v47 = vld [vmem:[#allocation5 + $0xd8] ss:$20 sps:$4 sm:$0xff]  }
  0xbd   :  { %1875 = vmatpush1.bf16.msra.mxu0 %v2674_v48  ;;  %v2758_v48 = vld [vmem:[#allocation5 + $0x1f0] ss:$20 sps:$4 sm:$0xff]  }
  0xbe   :  { %1876 = vmatprep.subr.bf16.mxu0 %v2682_v49  ;;  %v2757_v49 = vld [vmem:[#allocation5 + $0x358] ss:$20 sps:$4 sm:$0xff]  }
  0xbf   :  { %1918 = vmatpush1.bf16.msra.mxu1 %v2677_v50  ;;  %v2760_v50 = vld [vmem:[#allocation5 + $0x470] ss:$20 sps:$4 sm:$0xff]  }
  0xc0   :  { %1919 = vmatprep.subr.bf16.mxu1 %v2685_v52  ;;  %v2762_v52 = vld [vmem:[#allocation5 + $0x1c8] ss:$20 sps:$4 sm:$0xff]  }
  0xc1   :  { %1877 = vmatpush1.bf16.msra.mxu0 %v2680_v53  ;;  %v2761_v53 = vld [vmem:[#allocation5 + $0x330] ss:$20 sps:$4 sm:$0xff]  }
  0xc2   :  { %1878 = vmatprep.subr.bf16.mxu0 %v2688_v54  ;;  %v2764_v54 = vld [vmem:[#allocation5 + $0x448] ss:$20 sps:$4 sm:$0xff]  }
  0xc3   :  { %1920 = vmatpush1.bf16.msra.mxu1 %v2683_v55  ;;  %v2766_v55 = vld [vmem:[#allocation5 + $0x1a0] ss:$20 sps:$4 sm:$0xff]  }
  0xc4   :  { %1921 = vmatprep.subr.bf16.mxu1 %v2691_v56  ;;  %v2765_v56 = vld [vmem:[#allocation5 + $0x308] ss:$20 sps:$4 sm:$0xff]  }
  0xc5   :  { %1879 = vmatpush1.bf16.msra.mxu0 %v2686_v58  ;;  %v2768_v58 = vld [vmem:[#allocation5 + $0x420] ss:$20 sps:$4 sm:$0xff]  }
  0xc6   :  { %1880 = vmatprep.subr.bf16.mxu0 %v2694_v59  ;;  %v2767_v59 = vld [vmem:[#allocation5 + $0x60] ss:$20 sps:$4 sm:$0xff]  }
  0xc7   :  { %1922 = vmatpush1.bf16.msra.mxu1 %v2689_v60  ;;  %v2770_v60 = vld [vmem:[#allocation5 + $0x178] ss:$20 sps:$4 sm:$0xff]  }
  0xc8   :  { %1923 = vmatprep.subr.bf16.mxu1 %v2697_v61  ;;  %v2769_v61 = vld [vmem:[#allocation5 + $0x2e0] ss:$20 sps:$4 sm:$0xff]  }
  0xc9   :  { %1881 = vmatpush1.bf16.msra.mxu0 %v2692_v51  ;;  %v2772_v51 = vld [vmem:[#allocation5 + $0x3f8] ss:$20 sps:$4 sm:$0xff]  }
  0xca   :  { %1882 = vmatprep.subr.bf16.mxu0 %v2700_v62  ;;  %v2771_v62 = vld [vmem:[#allocation5 + $0x38] ss:$20 sps:$4 sm:$0xff]  }
  0xcb   :  { %1924 = vmatpush1.bf16.msra.mxu1 %v2695_v63  ;;  %v2774_v63 = vld [vmem:[#allocation5 + $0x150] ss:$20 sps:$4 sm:$0xff]  }
  0xcc   :  { %1925 = vmatprep.subr.bf16.mxu1 %v2703_v1  ;;  %v2773_v1 = vld [vmem:[#allocation5 + $0x2b8] ss:$20 sps:$4 sm:$0xff]  }
  0xcd   :  { %1883 = vmatpush2.bf16.msra.mxu0 %v2698_v2  ;;  %v2776_v2 = vld [vmem:[#allocation5 + $0x3d0] ss:$20 sps:$4 sm:$0xff]  }
  0xce   :  { %1884 = vmatprep.subr.bf16.mxu0 %v2706_v3  ;;  %v2775_v3 = vld [vmem:[#allocation5 + $0x10] ss:$20 sps:$4 sm:$0xff]  }
  0xcf   :  { %1926 = vmatpush2.bf16.msra.mxu1 %v2701_v4  ;;  %v2778_v4 = vld [vmem:[#allocation5 + $0x768] ss:$20 sps:$4 sm:$0xff]  }
  0xd0   :  { %1927 = vmatprep.subr.bf16.mxu1 %v2709_v6  ;;  %v2777_v6 = vld [vmem:[#allocation5 + $0x290] ss:$20 sps:$4 sm:$0xff]  }
  0xd1   :  { %1885 = vmatpush2.bf16.msra.mxu0 %v2704_v7  ;;  %v2779_v7 = vld [vmem:[#allocation5 + $0x628] ss:$20 sps:$4 sm:$0xff]  }
  0xd2   :  { %1886 = vmatprep.subr.bf16.mxu0 %v2712_v8  ;;  %v2780_v8 = vld [vmem:[#allocation5 + $0x740] ss:$20 sps:$4 sm:$0xff]  }
  0xd3   :  { %1928 = vmatpush2.bf16.msra.mxu1 %v2707_v9  ;;  %v2781_v9 = vld [vmem:[#allocation5 + $0x600] ss:$20 sps:$4 sm:$0xff]  }
  0xd4   :  { %1929 = vmatprep.subr.bf16.mxu1 %v2715_v10  ;;  %v2782_v10 = vld [vmem:[#allocation5 + $0x718] ss:$20 sps:$4 sm:$0xff]  }
  0xd5   :  { %1887 = vmatpush2.bf16.msra.mxu0 %v2710_v11  ;;  %v2783_v11 = vld [vmem:[#allocation5 + $0x5d8] ss:$20 sps:$4 sm:$0xff]  }
  0xd6   :  { %1888 = vmatprep.subr.bf16.mxu0 %v2718_v12  ;;  %v2784_v12 = vld [vmem:[#allocation5 + $0x6f0] ss:$20 sps:$4 sm:$0xff]  }
  0xd7   :  { %1930 = vmatpush2.bf16.msra.mxu1 %v2713_v13  ;;  %v2785_v13 = vld [vmem:[#allocation5 + $0x5b0] ss:$20 sps:$4 sm:$0xff]  }
  0xd8   :  { %1931 = vmatprep.subr.bf16.mxu1 %v2721_v14  ;;  %v2786_v14 = vld [vmem:[#allocation5 + $0x6c8] ss:$20 sps:$4 sm:$0xff]  }
  0xd9   :  { %1889 = vmatpush2.bf16.msra.mxu0 %v2716_v15  ;;  %v2787_v15 = vld [vmem:[#allocation5 + $0x588] ss:$20 sps:$4 sm:$0xff]  }
  0xda   :  { %1890 = vmatprep.subr.bf16.mxu0 %v2724_v16  ;;  %v2789_v16 = vld [vmem:[#allocation5 + $0x560] ss:$20 sps:$4 sm:$0xff]  }
  0xdb   :  { %1932 = vmatpush2.bf16.msra.mxu1 %v2719_v18  ;;  %v2792_v18 = vld [vmem:[#allocation5 + $0x650] ss:$20 sps:$4 sm:$0xff]  }
  0xdc   :  { %1933 = vmatprep.subr.bf16.mxu1 %v2727_v19  ;;  %v2793_v19 = vld [vmem:[#allocation5 + $0x510] ss:$20 sps:$4 sm:$0xff]  }
  0xdd   :  { %1891 = vmatpush2.bf16.msra.mxu0 %v2722_v21 }
  0xde   :  { %1892 = vmatprep.subr.bf16.mxu0 %v2730_v22  ;;  %v355_v22 = vsub.s32 0, %v2921_v44 }
  0xdf   :  { %1934 = vmatpush2.bf16.msra.mxu1 %v2725_v23  ;;  %v359_v23 = vsub.s32 1, %v2921_v44 }
  0xe0   :  { %1935 = vmatprep.subr.bf16.mxu1 %v2733_v24  ;;  %v2972_v24 = vld [vmem:[#allocation7] sm:$0x1f] }
  0xe1   :  { %1893 = vmatpush2.bf16.msra.mxu0 %v2728_v25 }
  0xe2   :  { %1894 = vmatprep.subr.bf16.mxu0 %v2736_v26 }
  0xe3   :  { %1936 = vmatpush2.bf16.msra.mxu1 %v2731_v27  ;;  %v356_v27 = vrot.slane %v2972_v24, %v355_v22 }
  0xe4   :  { %1937 = vmatprep.subr.bf16.mxu1 %v2739_v28  ;;  %v360_v28 = vrot.slane %v2972_v24, %v359_v23 }
  0xe5   :  { %1895 = vmatpush2.bf16.msra.mxu0 %v2734_v30 }
  0xe6   :  { %1896 = vmatprep.subr.bf16.mxu0 %v2742_v31 }
  0xe7   :  { %1938 = vmatpush2.bf16.msra.mxu1 %v2737_v32 }
  0xe8   :  { %1939 = vmatprep.subr.bf16.mxu1 %v2745_v33 }
  0xe9   :  { %1897 = vmatpush2.bf16.msra.mxu0 %v2740_v34 }
  0xea   :  { %2375 = vmatprep.subr.bf16.mxu0 %v2746_v35 }
  0xeb   :  { %1940 = vmatpush2.bf16.msra.mxu1 %v2743_v36 }
  0xec   :  { %1899 = vmatmul.mubr.bf16.vlgmr.msra.gmra.mxu0 %v2938_v20  ;;  %2397 = vmatprep.subr.bf16.mxu1 %v2748_v37 }
  0xed   :  { %2376 = vmatpush3.bf16.msra.mxu0 %v2747_v38  ;;  %1984 = vmatprep.mubr.bf16.mxu0 %v2928_v0  ;;  %v2759_v0 = vld [vmem:[#allocation5 + $0xb0] ss:$20 sps:$4 sm:$0xff]  }
  0xee   :  { %1942 = vmatmul.mubr.bf16.vlgmr.msra.gmra.mxu1 %v2956_v29  ;;  %2377 = vmatprep.subr.bf16.mxu0 %v2750_v39 }
  0xef   :  { %2398 = vmatpush3.bf16.msra.mxu1 %v2749_v40  ;;  %2025 = vmatprep.mubr.bf16.mxu1 %v2933_v5  ;;  %v2763_v5 = vld [vmem:[#allocation5 + $0x88] ss:$20 sps:$4 sm:$0xff]  }
  0xf0   :  { %2399 = vmatprep.subr.bf16.mxu1 %v2752_v41 }
  0xf1   :  { %2378 = vmatpush3.bf16.msra.mxu0 %v2751_v42 }
  0xf2   :  { %2379 = vmatprep.subr.bf16.mxu0 %v2754_v43 }
  0xf3   :  { %2400 = vmatpush3.bf16.msra.mxu1 %v2753_v45 }
  0xf4   :  { %2401 = vmatprep.subr.bf16.mxu1 %v2756_v46 }
  0xf5   :  { %2380 = vmatpush3.bf16.msra.mxu0 %v2755_v47 }
  0xf6   :  { %2381 = vmatprep.subr.bf16.mxu0 %v2758_v48 }
  0xf7   :  { %2402 = vmatpush3.bf16.msra.mxu1 %v2757_v49 }
  0xf8   :  { %2403 = vmatprep.subr.bf16.mxu1 %v2760_v50 }
  0xf9   :  { %2382 = vmatpush3.bf16.msra.mxu0 %v2759_v0 }
  0xfa   :  { %2383 = vmatprep.subr.bf16.mxu0 %v2762_v52 }
  0xfb   :  { %2404 = vmatpush3.bf16.msra.mxu1 %v2761_v53 }
  0xfc   :  { %2405 = vmatprep.subr.bf16.mxu1 %v2764_v54 }
  0xfd   :  { %2384 = vmatpush3.bf16.msra.mxu0 %v2763_v5 }
  0xfe   :  { %2385 = vmatprep.subr.bf16.mxu0 %v2766_v55  ;;  %v363_v55 = vsub.s32 2, %v2921_v44 }
  0xff   :  { %2406 = vmatpush3.bf16.msra.mxu1 %v2765_v56 }
 0x100   :  { %2407 = vmatprep.subr.bf16.mxu1 %v2768_v58  ;;  %v367_v58 = vsub.s32 3, %v2921_v44 }
 0x101   :  { %2386 = vmatpush3.bf16.msra.mxu0 %v2767_v59  ;;  %v364_v59 = vrot.slane %v2972_v24, %v363_v55 }
 0x102   :  { %2387 = vmatprep.subr.bf16.mxu0 %v2770_v60 }
 0x103   :  { %2408 = vmatpush3.bf16.msra.mxu1 %v2769_v61  ;;  %v368_v61 = vrot.slane %v2972_v24, %v367_v58 }
 0x104   :  { %2409 = vmatprep.subr.bf16.mxu1 %v2772_v51 }
 0x105   :  { %2388 = vmatpush3.bf16.msra.mxu0 %v2771_v62 }
 0x106   :  { %2389 = vmatprep.subr.bf16.mxu0 %v2774_v63 }
 0x107   :  { %2410 = vmatpush3.bf16.msra.mxu1 %v2773_v1 }
 0x108   :  { %2411 = vmatprep.subr.bf16.mxu1 %v2776_v2 }
 0x109   :  { %2390 = vmatpush3.bf16.msra.mxu0 %v2775_v3 }
 0x10a   :  { %2419 = vmatprep.subr.bf16.mxu0 %v2778_v4 }
 0x10b   :  { %2412 = vmatpush3.bf16.msra.mxu1 %v2777_v6 }
 0x10c   :  { %1985 = vmatmul.mubr.bf16.vlgmr.msra.gmra.mxu0 %v2936_v17  ;;  %v2788_v17 = vld [vmem:[#allocation5 + $0x6a0] ss:$20 sps:$4 sm:$0xff]  }
 0x10d   :  { %2420 = vmatpush3.bf16.msra.mxu0 %v2779_v7  ;;  %2066 = vmatprep.mubr.bf16.mxu0 %v2951_v57  ;;  %v2790_v57 = vld [vmem:[#allocation5 + $0x678] ss:$20 sps:$4 sm:$0xff]  }
 0x10e   :  { %2026 = vmatmul.mubr.bf16.vlgmr.msra.gmra.mxu1 %v2938_v20  ;;  %2421 = vmatprep.subr.bf16.mxu0 %v2780_v8  ;;  %v2791_v20 = vld [vmem:[#allocation5 + $0x538] ss:$20 sps:$4 sm:$0xff]  }
 0x111   :  { %2422 = vmatpush3.bf16.msra.mxu0 %v2781_v9 }
 0x112   :  { %2423 = vmatprep.subr.bf16.mxu0 %v2782_v10 }
 0x115   :  { %2424 = vmatpush3.bf16.msra.mxu0 %v2783_v11 }
 0x116   :  { %2425 = vmatprep.subr.bf16.mxu0 %v2784_v12 }
 0x119   :  { %2426 = vmatpush3.bf16.msra.mxu0 %v2785_v13 }
 0x11a   :  { %2427 = vmatprep.subr.bf16.mxu0 %v2786_v14 }
 0x11d   :  { %2428 = vmatpush3.bf16.msra.mxu0 %v2787_v15 }
 0x11e   :  { %2429 = vmatprep.subr.bf16.mxu0 %v2788_v17 }
 0x121   :  { %2430 = vmatpush3.bf16.msra.mxu0 %v2789_v16 }
 0x122   :  { %2431 = vmatprep.subr.bf16.mxu0 %v2790_v57 }
 0x125   :  { %2432 = vmatpush3.bf16.msra.mxu0 %v2791_v20 }
 0x126   :  { %2433 = vmatprep.subr.bf16.mxu0 %v2792_v18 }
 0x129   :  { %2434 = vmatpush3.bf16.msra.mxu0 %v2793_v19 }
 0x12c   :  { %2067 = vmatmul.mubr.bf16.vlgmr.msra.gmra.mxu0 %v2956_v29  ;;  %v1728_v21 = vpop.f32.mrf.mxu0 }
 0x12d   :  { %v1771_v26 = vpop.f32.mrf.mxu1  ;;  %v1729_v32 = vadd.f32 %v1728_v21, %v356_v27 }
 0x12e   :  { %v1730_v25 = vpop.f32.mrf.mxu0 }
 0x12f   :  { %v1773_v31 = vpop.f32.mrf.mxu1  ;;  %v1731_v33 = vadd.f32 %v1730_v25, %v360_v28  ;;  %v1772_v36 = vadd.f32 %v1771_v26, %v1729_v32 }
 0x130   :  { %v1732_v30 = vpop.f32.mrf.mxu0 }
 0x131   :  { %v1775_v35 = vpop.f32.mrf.mxu1  ;;  %v1733_v37 = vadd.f32 %v1732_v30, %v356_v27  ;;  %v1774_v38 = vadd.f32 %v1773_v31, %v1731_v33  ;;  %v371_v27 = vsub.s32 4, %v2921_v44 }
 0x132   :  { %v1734_v34 = vpop.f32.mrf.mxu0 }
 0x133   :  { %v1735_v39 = vadd.f32 %v1734_v34, %v360_v28  ;;  %v1777_v40 = vpop.f32.mrf.mxu1  ;;  %v1776_v46 = vadd.f32 %v1775_v35, %v1733_v37  ;;  %v372_v31 = vrot.slane %v2972_v24, %v371_v27 }
 0x135   :  { %v1778_v47 = vadd.f32 %v1777_v40, %v1735_v39 }
 0x16c   :  { %v1814_v29 = vpop.f32.mrf.mxu0 }
 0x16d   :  { %v1815_v42 = vadd.f32 %v1814_v29, %v1772_v36 }
 0x16e   :  { %v1816_v41 = vpop.f32.mrf.mxu0  ;;  %v1857_v5 = vpop.f32.mrf.mxu1 }
 0x16f   :  { %v1817_v43 = vadd.f32 %v1816_v41, %v1774_v38  ;;  %v1858_v51 = vadd.f32 %v1857_v5, %v364_v59 }
 0x170   :  { %v1818_v45 = vpop.f32.mrf.mxu0  ;;  %v1859_v56 = vpop.f32.mrf.mxu1 }
 0x171   :  { %v2085_v48 = vcombine.low %v1815_v42, %v1817_v43  ;;  %v2086_v49 = vcombine.high %v1815_v42, %v1817_v43  ;;  %v1819_v0 = vadd.f32 %v1818_v45, %v1776_v46  ;;  %v1860_v1 = vadd.f32 %v1859_v56, %v368_v61 }
 0x172   :  { %v1820_v50 = vpop.f32.mrf.mxu0  ;;  %v1861_v60 = vpop.f32.mrf.mxu1 }
 0x173   :  { %2105 = vst [vmem:[#allocation8] sm:$0xff] %v2085_v48  ;;  %2108 = vst [vmem:[#allocation8 + $0x14] sm:$0xff] %v2086_v49  ;;  %v1821_v52 = vadd.f32 %v1820_v50, %v1778_v47  ;;  %v1862_v6 = vadd.f32 %v1861_v60, %v364_v59 }
 0x174   :  { %v1863_v62 = vpop.f32.mrf.mxu1 }
 0x175   :  { %v2090_v53 = vcombine.low %v1819_v0, %v1821_v52  ;;  %v2091_v54 = vcombine.high %v1819_v0, %v1821_v52  ;;  %v1864_v10 = vadd.f32 %v1863_v62, %v368_v61 }
 0x177   :  { %2111 = vst [vmem:[#allocation8 + $0x28] sm:$0xff] %v2090_v53  ;;  %2114 = vst [vmem:[#allocation8 + $0x3c] sm:$0xff] %v2091_v54 }
 0x1ac   :  { %v1900_v63 = vpop.f32.mrf.mxu0 }
 0x1ad   :  { %v1901_v2 = vadd.f32 %v1900_v63, %v1858_v51 }
 0x1ae   :  { %v1902_v3 = vpop.f32.mrf.mxu0  ;;  %v1943_v4 = vpop.f32.mrf.mxu1 }
 0x1af   :  { %v1903_v7 = vadd.f32 %v1902_v3, %v1860_v1  ;;  %v1944_v11 = vadd.f32 %v1943_v4, %v1901_v2 }
 0x1b0   :  { %v1904_v8 = vpop.f32.mrf.mxu0  ;;  %v1945_v9 = vpop.f32.mrf.mxu1 }
 0x1b1   :  { %v1905_v12 = vadd.f32 %v1904_v8, %v1862_v6  ;;  %v1946_v13 = vadd.f32 %v1945_v9, %v1903_v7 }
 0x1b2   :  { %v1906_v14 = vpop.f32.mrf.mxu0  ;;  %v1947_v15 = vpop.f32.mrf.mxu1 }
 0x1b3   :  { %v2087_v17 = vcombine.low %v1944_v11, %v1946_v13  ;;  %v2088_v16 = vcombine.high %v1944_v11, %v1946_v13  ;;  %v1907_v57 = vadd.f32 %v1906_v14, %v1864_v10  ;;  %v1948_v18 = vadd.f32 %v1947_v15, %v1905_v12 }
 0x1b4   :  { %v1949_v20 = vpop.f32.mrf.mxu1 }
 0x1b5   :  { %2106 = vst [vmem:[#allocation8 + $0x8] sm:$0xff] %v2087_v17  ;;  %2109 = vst [vmem:[#allocation8 + $0x1c] sm:$0xff] %v2088_v16  ;;  %v1950_v19 = vadd.f32 %v1949_v20, %v1907_v57 }
 0x1b7   :  { %v2092_v21 = vcombine.low %v1948_v18, %v1950_v19  ;;  %v2093_v22 = vcombine.high %v1948_v18, %v1950_v19 }
 0x1b9   :  { %2112 = vst [vmem:[#allocation8 + $0x30] sm:$0xff] %v2092_v21  ;;  %2115 = vst [vmem:[#allocation8 + $0x44] sm:$0xff] %v2093_v22 }
 0x1cc   :  { %v2391_v23 = vpop.f32.mrf.mxu0 }
 0x1ce   :  { %v2392_v25 = vpop.f32.mrf.mxu0  ;;  %v2413_v26 = vpop.f32.mrf.mxu1 }
 0x1cf   :  { %v2393_v32 = vadd.f32 %v2392_v25, %v2391_v23 }
 0x1d0   :  { %v2394_v28 = vpop.f32.mrf.mxu0  ;;  %v2414_v30 = vpop.f32.mrf.mxu1 }
 0x1d1   :  { %v1987_v35 = vadd.f32 %v2393_v32, %v372_v31  ;;  %v2415_v29 = vadd.f32 %v2414_v30, %v2413_v26 }
 0x1d2   :  { %v2395_v33 = vpop.f32.mrf.mxu0  ;;  %v2416_v34 = vpop.f32.mrf.mxu1 }
 0x1d3   :  { %v2396_v36 = vadd.f32 %v2395_v33, %v2394_v28  ;;  %v2028_v40 = vadd.f32 %v2415_v29, %v1987_v35 }
 0x1d4   :  { %v2417_v37 = vpop.f32.mrf.mxu1 }
 0x1d5   :  { %v1990_v41 = vadd.f32 %v2396_v36, %v372_v31  ;;  %v2418_v42 = vadd.f32 %v2417_v37, %v2416_v34 }
 0x1d7   :  { %v2031_v47 = vadd.f32 %v2418_v42, %v1990_v41 }
 0x1ec   :  { %v2435_v38 = vpop.f32.mrf.mxu0 }
 0x1ee   :  { %v2436_v39 = vpop.f32.mrf.mxu0 }
 0x1ef   :  { %v2437_v43 = vadd.f32 %v2436_v39, %v2435_v38 }
 0x1f0   :  { %v2438_v45 = vpop.f32.mrf.mxu0 }
 0x1f1   :  { %v2069_v46 = vadd.f32 %v2437_v43, %v2028_v40 }
 0x1f2   :  { %v2439_v44 = vpop.f32.mrf.mxu0 }
 0x1f3   :  { %v2089_v48 = vcombine.high %v2069_v46, %v2069_v46  ;;  %2107 = vst [vmem:[#allocation8 + $0x10] sm:$0xf] %v2069_v46  ;;  %v2440_v24 = vadd.f32 %v2439_v44, %v2438_v45 }
 0x1f5   :  { %2110 = vst [vmem:[#allocation8 + $0x24] sm:$0xf] %v2089_v48  ;;  %v2072_v49 = vadd.f32 %v2440_v24, %v2031_v47 }
 0x1f7   :  { %v2094_v50 = vcombine.high %v2072_v49, %v2072_v49  ;;  %2113 = vst [vmem:[#allocation8 + $0x38] sm:$0xf] %v2072_v49 }
 0x1f9   :  { %2116 = vst [vmem:[#allocation8 + $0x4c] sm:$0xf] %v2094_v50 }
 0x1fa   :  { %2121 = vsyncadd [#allocation4], 960  ;;  %s2888_s0 = smov [#allocation8]  }
 0x1fb   :  { %s2122_s2 = sshll.u32 %s2888_s0, 4  ;;  %s2123_s2 = int_to_ptr.vmem [resolvable:$true] %s2122_s2 }
 0x1fc   :  { %s2854_s5 = scalar_lea.vmem %s2123_s2, 320  ;;  %s2858_s6 = scalar_lea.vmem %s2123_s2, 1280 }
 0x1fd   :  { %p2855_p1 = scmp.ne.s32.totalorder %s2123_s2, %s2854_s5  ;;  %p2859_p2 = scmp.lt.s32.totalorder %s2123_s2, %s2123_s2 }
 0x1fe   :  { %p2860_p3 = scmp.lt.s32.totalorder %s2858_s6, %s2854_s5 }
 0x200   :  { %p2861_p4 = por %p2860_p3, %p2859_p2 }
 0x202   :  { %p2862_p5 = pnand %p2861_p4, %p2855_p1 }
 0x204   :  { %2865 = shalt.err (!%p2862_p5)
}
 0x205   :  { %2128 = dma.vmem_to_hbm [thread:$0]  %s2123_s2, 320, %s2991_s3, [#allocation4], %s2881_s15, %s2881_s15, %s2882_s16  }
 0x206   :  { %2878 = dma.done.wait [#allocation4], 1280  }
 0x207   :  { %2879 = vsyncadd [#allocation4], 4294966016 }
 0x208   :  { %2132 = vsyncpa [#allocation3], 1 }
 0x209   :  { %2133 = vsyncpa [#allocation6], 1 }
 0x20a   :  { %2134 = vsyncpa [#allocation4], 1 }

</bundles_post_ra>
